<compile_context>
chip_gen: v6e
topology: v6e:2x2x1
jax: 0.10.0
libtpu: 0.0.40
codegen_flags: <defaults>
</compile_context>

<pallas_src>
import jax
import jax.numpy as jnp
from jax import lax
from jax.experimental import pallas as pl
from jax.experimental.pallas import tpu as pltpu

BN_EPS = 1e-5
_MAX_TILE = 4096          # lane-tile upper bound (multiple of 128)


def _tpu_defaults():
    """Generation-aware VMEM budget and VPU/MXU crossover (best effort)."""
    vmem_cap = 128 * 1024 * 1024
    vpu_cin_max = 8
    try:
        info = pltpu.get_tpu_info()
        vmem_cap = int(getattr(info, "vmem_capacity_bytes", vmem_cap))
        name = ""
        for attr in ("chip_version", "version", "name"):
            v = getattr(info, attr, None)
            if v is not None:
                name = str(v).lower()
                break
        # v5's 128-wide MXU reaches useful K-utilization earlier; v7x's HBM BW
        # makes the 2*Cin-FMA VPU path the binding slot sooner.  v6e keeps 8.
        if ("5" in name) or ("7" in name):
            vpu_cin_max = 4
    except Exception:
        pass
    # Leave headroom: at most half of physical VMEM, capped at 64 MiB.
    return min(vmem_cap // 2, 64 * 1024 * 1024), vpu_cin_max


_VMEM_BUDGET, _VPU_CIN_MAX = _tpu_defaults()


def _conv1x1(w, x):
    """1x1 conv as a channel contraction in NCL layout.

    w: (Cout, Cin) f32, x: (Cin, TL)  ->  (Cout, TL) float32.
    """
    cout, cin = w.shape
    if cin <= _VPU_CIN_MAX:
        # Tiny contraction: a handful of VPU broadcast-FMAs beats a nearly
        # empty systolic pass through the MXU.
        z = w[:, 0:1].astype(jnp.float32) * x[0:1, :].astype(jnp.float32)
        for c in range(1, cin):
            z = z + w[:, c:c + 1].astype(jnp.float32) * x[c:c + 1, :].astype(jnp.float32)
        return z
    return jnp.dot(w, x, preferred_element_type=jnp.float32)


def _stats_kernel(x_ref, gram_ref, xsum_ref):
    """Phase 1: raw-x moments.  gram += x x^T  (MXU, K = TL),  xsum += sum_l x."""
    @pl.when(pl.program_id(2) == 0)
    def _():
        gram_ref[...] = jnp.zeros_like(gram_ref)
        xsum_ref[...] = jnp.zeros_like(xsum_ref)

    nb = x_ref.shape[0]
    for b in range(nb):                                   # static, small
        xb = x_ref[b]                                     # (Cin, TL)
        gram_ref[0, 0] += jnp.dot(xb, xb.T, preferred_element_type=jnp.float32)
        # Single cheap cross-lane reduce per (batch, tile); could be folded
        # into the Gram with an augmented ones-row if it ever shows up.
        xsum_ref[0, 0] += jnp.sum(xb.astype(jnp.float32), axis=-1, keepdims=True)


def _apply_kernel(x_ref, y_ref, w2_ref, shift_ref, o_ref):
    """Phase 2: out = relu(y + w2 @ x + shift)   (BN scale folded into w2)."""
    w2 = w2_ref[...]
    shift = shift_ref[...]
    nb = x_ref.shape[0]
    for b in range(nb):                                   # static, small
        z = _conv1x1(w2, x_ref[b]) + shift                # (Cout, TL) f32
        yb = y_ref[b]
        if yb.dtype == jnp.float32:
            o_ref[b] = jnp.maximum(yb + z, 0.0)
        else:
            # Keep the dominant y/out streams in their native (e.g. bf16)
            # width; z stays f32 until this single cast.
            o_ref[b] = jnp.maximum(yb + z.astype(yb.dtype), 0)


def _round_up(a, b):
    return (a + b - 1) // b * b


def _pick_nb(N, Cin, Cout, tl, itemsize, budget):
    """Largest divisor of N (<=8) whose double-buffered tile fits the budget."""
    per_batch = 2 * (Cin + 2 * Cout) * tl * itemsize
    for d in range(min(N, 8), 0, -1):
        if N % d == 0 and d * per_batch <= budget:
            return d
    return 1


def _choose_tiling(N, Cin, Cout, L, itemsize, budget):
    """Returns (L_pad, TL, n_l, Nb)."""
    per_lane = 2 * (Cin + 2 * Cout) * itemsize            # x + y + out, double-buffered
    cap = max(128, min(_MAX_TILE, (budget // max(per_lane, 1)) // 128 * 128))
    if L % 128 == 0:
        L_pad = L
    elif L <= 512:
        # Tiny ragged L: one full-L block (masked lane stores are cheaper than
        # a padding copy at this size).
        return L, L, 1, _pick_nb(N, Cin, Cout, L, itemsize, budget)
    else:
        L_pad = _round_up(L, 128)
    blocks = L_pad // 128
    tl = 128
    for k in range(min(blocks, cap // 128), 0, -1):
        if blocks % k == 0:
            tl = 128 * k
            break
    n_l = L_pad // tl
    nb = _pick_nb(N, Cin, Cout, tl, itemsize, budget) if n_l == 1 else 1
    return L_pad, tl, n_l, nb


def residual_forward(x_ncl, y_ncl, conv_weight, gamma, beta):
    """x_ncl: (N, Cin, L), y_ncl: (N, Cout, L), conv_weight: (Cout, Cin) (k=1 squeezed)."""
    N, Cin, L = x_ncl.shape
    Cout = conv_weight.shape[0]
    assert y_ncl.shape == (N, Cout, L)

    itemsize = max(x_ncl.dtype.itemsize, y_ncl.dtype.itemsize)
    L_pad, TL, n_l, Nb = _choose_tiling(N, Cin, Cout, L, itemsize, _VMEM_BUDGET)

    if L_pad != L:
        pad = ((0, 0), (0, 0), (0, L_pad - L))
        x_in = jnp.pad(x_ncl, pad)                        # zero columns: stats unchanged
        y_in = jnp.pad(y_ncl, pad)
    else:
        x_in, y_in = x_ncl, y_ncl

    nbg = N // Nb

    # ---- Phase 1: raw-x moments (Gram + sum); weight never touches phase 1 --
    # Extra "parallel" L_outer axis keeps v7x's second TensorCore busy when N
    # is small; partial per-slot stats are summed in the JAX finalize.
    n_lo = 2 if (n_l >= 2 and n_l % 2 == 0) else 1
    n_li = n_l // n_lo
    x_stats_spec = pl.BlockSpec((Nb, Cin, TL), lambda n, lo, li: (n, 0, lo * n_li + li))
    gram_spec = pl.BlockSpec((1, 1, Cin, Cin), lambda n, lo, li: (n, lo, 0, 0))
    xsum_spec = pl.BlockSpec((1, 1, Cin, 1), lambda n, lo, li: (n, lo, 0, 0))

    grams, xsums = pl.pallas_call(
        _stats_kernel,
        grid=(nbg, n_lo, n_li),
        in_specs=[x_stats_spec],
        out_specs=[gram_spec, xsum_spec],
        out_shape=[jax.ShapeDtypeStruct((nbg, n_lo, Cin, Cin), jnp.float32),
                   jax.ShapeDtypeStruct((nbg, n_lo, Cin, 1), jnp.float32)],
        compiler_params=pltpu.CompilerParams(
            dimension_semantics=("parallel", "parallel", "arbitrary"),
            vmem_limit_bytes=_VMEM_BUDGET,
        ),
    )(x_in)

    # ---- Finalize BN stats from x moments (tiny Cin/Cout-sized math) --------
    w32 = conv_weight.astype(jnp.float32)
    gram = jnp.sum(grams, axis=(0, 1))                    # (Cin, Cin) = sum x x^T
    xsum = jnp.sum(xsums, axis=(0, 1))                    # (Cin, 1)   = sum x
    count = float(N * L)                                  # original L (pad cols are zero)
    mean = (w32 @ xsum) / count                           # (Cout, 1)
    sumsq_z = jnp.sum((w32 @ gram) * w32, axis=1, keepdims=True)   # diag(W G W^T)
    var = jnp.maximum(sumsq_z / count - mean * mean, 0.0)  # biased batch variance
    inv_std = lax.rsqrt(var + BN_EPS)
    scale = gamma.reshape(-1, 1).astype(jnp.float32) * inv_std
    shift = beta.reshape(-1, 1).astype(jnp.float32) - mean * scale
    w2 = w32 * scale                                      # BN scale folded into conv weight

    # ---- Phase 2: out = relu(y + conv_w2(x) + shift), y aliased into out ----
    x_spec = pl.BlockSpec((Nb, Cin, TL), lambda n, l: (n, 0, l))
    y_spec = pl.BlockSpec((Nb, Cout, TL), lambda n, l: (n, 0, l))
    w_spec = pl.BlockSpec((Cout, Cin), lambda n, l: (0, 0))
    c_spec = pl.BlockSpec((Cout, 1), lambda n, l: (0, 0))

    out = pl.pallas_call(
        _apply_kernel,
        grid=(nbg, n_l),
        in_specs=[x_spec, y_spec, w_spec, c_spec],
        out_specs=y_spec,
        out_shape=jax.ShapeDtypeStruct((N, Cout, L_pad), y_ncl.dtype),
        input_output_aliases={1: 0},
        compiler_params=pltpu.CompilerParams(
            dimension_semantics=("parallel", "parallel"),
            vmem_limit_bytes=_VMEM_BUDGET,
        ),
    )(x_in, y_in, w2, shift)

    if L_pad != L:
        out = out[:, :, :L]
    return out


def residual_reference(x_ncl, y_ncl, conv_weight, gamma, beta):
    """Pure-JAX reference mirroring PyTorch training-mode forward."""
    z = jnp.einsum("oc,ncl->nol", conv_weight, x_ncl)
    mean = jnp.mean(z, axis=(0, 2), keepdims=True)
    var = jnp.mean((z - mean) ** 2, axis=(0, 2), keepdims=True)
    z_bn = (z - mean) * lax.rsqrt(var + BN_EPS)
    z_bn = z_bn * gamma.reshape(1, -1, 1) + beta.reshape(1, -1, 1)
    return jnp.maximum(y_ncl + z_bn, 0.0)


if __name__ == "__main__":
    key = jax.random.PRNGKey(0)
    # y is aliased into the kernel output; donating it lets XLA skip the
    # defensive copy in front of the aliased pallas_call.
    fwd_donate = jax.jit(residual_forward, donate_argnums=(1,))
    fwd_plain = jax.jit(residual_forward)

    def run_case(N, Cin, filters, L):
        Cout = 4 * filters
        k_x, k_y, k_w = jax.random.split(jax.random.fold_in(key, 7 * L + Cin), 3)
        x = jax.random.normal(k_x, (N, Cin, L), jnp.float32)       # conv input (NCL)
        y = jax.random.normal(k_y, (N, Cout, L), jnp.float32)      # residual input (NCL)
        bound = 1.0 / (Cin ** 0.5)                                  # Conv1d default init bound
        w = jax.random.uniform(k_w, (Cout, Cin), jnp.float32, -bound, bound)
        gamma = jnp.ones((Cout,), jnp.float32)                      # BatchNorm1d default params
        beta = jnp.zeros((Cout,), jnp.float32)

        ref = residual_reference(x, y, w, gamma, beta)              # before y is donated
        needs_pad = (L % 128 != 0) and (L > 512)
        fwd = fwd_plain if needs_pad else fwd_donate                # padded runs reshape y
        out = fwd(x, y, w, gamma, beta)
        jax.block_until_ready(out)
        assert out.shape == (N, Cout, L)
        assert jnp.allclose(out, ref, atol=1e-3, rtol=1e-3), (
            f"mismatch vs reference at shape {(N, Cin, L)}")

    # Toy shape consistent with Residual(input_size=4, filters=2).
    run_case(N=2, Cin=4, filters=2, L=16)
    # MXU contraction path (Cin above the VPU crossover), single lane-dense tile.
    run_case(N=2, Cin=16, filters=8, L=2048)
    # Multi-tile L: exercises cross-tile stat accumulation + pipelined phase 2.
    run_case(N=2, Cin=4, filters=2, L=16384)
    # Ragged L > 512: exercises the pad-to-multiple-of-128 path.
    run_case(N=2, Cin=4, filters=2, L=1600)

    print("KERNEL_OK")
</pallas_src>

<mosaic_0001>
module attributes {stable_mosaic.version = 11 : i64} {
  func.func @_stats_kernel(%arg0: i32, %arg1: i32, %arg2: i32, %arg3: memref<2x4x16xf32, #tpu.memory_space<vmem>>, %arg4: memref<1x1x4x4xf32, #tpu.memory_space<vmem>>, %arg5: memref<1x1x4x1xf32, #tpu.memory_space<vmem>>) attributes {dimension_semantics = [#tpu.dimension_semantics<parallel>, #tpu.dimension_semantics<parallel>, #tpu.dimension_semantics<arbitrary>], iteration_bounds = array<i64: 1, 1, 1>, scalar_prefetch = 0 : i64, scratch_operands = 0 : i64, tpu.core_type = #tpu.core_type<tc>, window_params = [{transform_indices = @transform_0, window_bounds = array<i64: 2, 4, 16>}, {transform_indices = @transform_1, window_bounds = array<i64: 1, 1, 4, 4>}, {transform_indices = @transform_2, window_bounds = array<i64: 1, 1, 4, 1>}]} {
    %c0_i32 = arith.constant 0 : i32
    %0 = arith.cmpi eq, %arg2, %c0_i32 : i32
    %1 = arith.extui %0 : i1 to i32
    %c0_i32_0 = arith.constant 0 : i32
    %2 = arith.cmpi ne, %1, %c0_i32_0 : i32
    scf.if %2 {
      %cst_40 = arith.constant 0.000000e+00 : f32
      %39 = vector.broadcast %cst_40 : f32 to vector<1x1x4x4xf32>
      %c0_41 = arith.constant 0 : index
      %c0_42 = arith.constant 0 : index
      %c0_43 = arith.constant 0 : index
      %c0_44 = arith.constant 0 : index
      %40 = vector.load %arg4[%c0_41, %c0_42, %c0_43, %c0_44] : memref<1x1x4x4xf32, #tpu.memory_space<vmem>>, vector<1x1x4x4xf32>
      tpu.vector_store %arg4[%c0_41, %c0_42, %c0_43, %c0_44], %39 {strides = array<i32>} : memref<1x1x4x4xf32, #tpu.memory_space<vmem>>, vector<1x1x4x4xf32>,
      %cst_45 = arith.constant 0.000000e+00 : f32
      %41 = vector.broadcast %cst_45 : f32 to vector<1x1x4x1xf32>
      %c0_46 = arith.constant 0 : index
      %c0_47 = arith.constant 0 : index
      %c0_48 = arith.constant 0 : index
      %c0_49 = arith.constant 0 : index
      %42 = vector.load %arg5[%c0_46, %c0_47, %c0_48, %c0_49] : memref<1x1x4x1xf32, #tpu.memory_space<vmem>>, vector<1x1x4x1xf32>
      tpu.vector_store %arg5[%c0_46, %c0_47, %c0_48, %c0_49], %41 {strides = array<i32>} : memref<1x1x4x1xf32, #tpu.memory_space<vmem>>, vector<1x1x4x1xf32>,
    } else {
    }
    %c0 = arith.constant 0 : index
    %c0_1 = arith.constant 0 : index
    %c0_2 = arith.constant 0 : index
    %3 = vector.load %arg3[%c0, %c0_1, %c0_2] : memref<2x4x16xf32, #tpu.memory_space<vmem>>, vector<1x4x16xf32>
    %4 = vector.shape_cast %3 : vector<1x4x16xf32> to vector<4x16xf32>
    %c0_3 = arith.constant 0 : index
    %c0_4 = arith.constant 0 : index
    %c0_5 = arith.constant 0 : index
    %c0_6 = arith.constant 0 : index
    %5 = vector.load %arg4[%c0_3, %c0_4, %c0_5, %c0_6] : memref<1x1x4x4xf32, #tpu.memory_space<vmem>>, vector<1x1x4x4xf32>
    %6 = vector.shape_cast %5 : vector<1x1x4x4xf32> to vector<4x4xf32>
    %7 = tpu.transpose %4, [1, 0] : vector<4x16xf32> -> vector<16x4xf32>
    %cst = arith.constant dense<0.000000e+00> : vector<4x4xf32>
    %8 = tpu.matmul %4, %7, %cst {dimension_numbers = #tpu.dot_dimension_numbers<[1], [0], [0], [1], [0, 0, 1, 1], [], []>} : vector<4x16xf32>, vector<16x4xf32>, vector<4x4xf32> -> vector<4x4xf32>
    %9 = arith.addf %6, %8 : vector<4x4xf32>
    %c0_7 = arith.constant 0 : index
    %c0_8 = arith.constant 0 : index
    %c0_9 = arith.constant 0 : index
    %c0_10 = arith.constant 0 : index
    %10 = vector.load %arg4[%c0_7, %c0_8, %c0_9, %c0_10] : memref<1x1x4x4xf32, #tpu.memory_space<vmem>>, vector<1x1x4x4xf32>
    %11 = vector.shape_cast %10 : vector<1x1x4x4xf32> to vector<4x4xf32>
    %12 = vector.shape_cast %9 : vector<4x4xf32> to vector<1x1x4x4xf32>
    tpu.vector_store %arg4[%c0_7, %c0_8, %c0_9, %c0_10], %12 {strides = array<i32>} : memref<1x1x4x4xf32, #tpu.memory_space<vmem>>, vector<1x1x4x4xf32>,
    %c0_11 = arith.constant 0 : index
    %c0_12 = arith.constant 0 : index
    %c0_13 = arith.constant 0 : index
    %c0_14 = arith.constant 0 : index
    %13 = vector.load %arg5[%c0_11, %c0_12, %c0_13, %c0_14] : memref<1x1x4x1xf32, #tpu.memory_space<vmem>>, vector<1x1x4x1xf32>
    %14 = vector.shape_cast %13 : vector<1x1x4x1xf32> to vector<4x1xf32>
    %cst_15 = arith.constant dense<0.000000e+00> : vector<4xf32>
    %15 = vector.multi_reduction <add>, %4, %cst_15 [1] : vector<4x16xf32> to vector<4xf32>
    %16 = vector.shape_cast %15 : vector<4xf32> to vector<4x1xf32>
    %17 = arith.addf %14, %16 : vector<4x1xf32>
    %c0_16 = arith.constant 0 : index
    %c0_17 = arith.constant 0 : index
    %c0_18 = arith.constant 0 : index
    %c0_19 = arith.constant 0 : index
    %18 = vector.load %arg5[%c0_16, %c0_17, %c0_18, %c0_19] : memref<1x1x4x1xf32, #tpu.memory_space<vmem>>, vector<1x1x4x1xf32>
    %19 = vector.shape_cast %18 : vector<1x1x4x1xf32> to vector<4x1xf32>
    %20 = vector.shape_cast %17 : vector<4x1xf32> to vector<1x1x4x1xf32>
    tpu.vector_store %arg5[%c0_16, %c0_17, %c0_18, %c0_19], %20 {strides = array<i32>} : memref<1x1x4x1xf32, #tpu.memory_space<vmem>>, vector<1x1x4x1xf32>,
    %c1 = arith.constant 1 : index
    %c0_20 = arith.constant 0 : index
    %c0_21 = arith.constant 0 : index
    %21 = vector.load %arg3[%c1, %c0_20, %c0_21] : memref<2x4x16xf32, #tpu.memory_space<vmem>>, vector<1x4x16xf32>
    %22 = vector.shape_cast %21 : vector<1x4x16xf32> to vector<4x16xf32>
    %c0_22 = arith.constant 0 : index
    %c0_23 = arith.constant 0 : index
    %c0_24 = arith.constant 0 : index
    %c0_25 = arith.constant 0 : index
    %23 = vector.load %arg4[%c0_22, %c0_23, %c0_24, %c0_25] : memref<1x1x4x4xf32, #tpu.memory_space<vmem>>, vector<1x1x4x4xf32>
    %24 = vector.shape_cast %23 : vector<1x1x4x4xf32> to vector<4x4xf32>
    %25 = tpu.transpose %22, [1, 0] : vector<4x16xf32> -> vector<16x4xf32>
    %cst_26 = arith.constant dense<0.000000e+00> : vector<4x4xf32>
    %26 = tpu.matmul %22, %25, %cst_26 {dimension_numbers = #tpu.dot_dimension_numbers<[1], [0], [0], [1], [0, 0, 1, 1], [], []>} : vector<4x16xf32>, vector<16x4xf32>, vector<4x4xf32> -> vector<4x4xf32>
    %27 = arith.addf %24, %26 : vector<4x4xf32>
    %c0_27 = arith.constant 0 : index
    %c0_28 = arith.constant 0 : index
    %c0_29 = arith.constant 0 : index
    %c0_30 = arith.constant 0 : index
    %28 = vector.load %arg4[%c0_27, %c0_28, %c0_29, %c0_30] : memref<1x1x4x4xf32, #tpu.memory_space<vmem>>, vector<1x1x4x4xf32>
    %29 = vector.shape_cast %28 : vector<1x1x4x4xf32> to vector<4x4xf32>
    %30 = vector.shape_cast %27 : vector<4x4xf32> to vector<1x1x4x4xf32>
    tpu.vector_store %arg4[%c0_27, %c0_28, %c0_29, %c0_30], %30 {strides = array<i32>} : memref<1x1x4x4xf32, #tpu.memory_space<vmem>>, vector<1x1x4x4xf32>,
    %c0_31 = arith.constant 0 : index
    %c0_32 = arith.constant 0 : index
    %c0_33 = arith.constant 0 : index
    %c0_34 = arith.constant 0 : index
    %31 = vector.load %arg5[%c0_31, %c0_32, %c0_33, %c0_34] : memref<1x1x4x1xf32, #tpu.memory_space<vmem>>, vector<1x1x4x1xf32>
    %32 = vector.shape_cast %31 : vector<1x1x4x1xf32> to vector<4x1xf32>
    %cst_35 = arith.constant dense<0.000000e+00> : vector<4xf32>
    %33 = vector.multi_reduction <add>, %22, %cst_35 [1] : vector<4x16xf32> to vector<4xf32>
    %34 = vector.shape_cast %33 : vector<4xf32> to vector<4x1xf32>
    %35 = arith.addf %32, %34 : vector<4x1xf32>
    %c0_36 = arith.constant 0 : index
    %c0_37 = arith.constant 0 : index
    %c0_38 = arith.constant 0 : index
    %c0_39 = arith.constant 0 : index
    %36 = vector.load %arg5[%c0_36, %c0_37, %c0_38, %c0_39] : memref<1x1x4x1xf32, #tpu.memory_space<vmem>>, vector<1x1x4x1xf32>
    %37 = vector.shape_cast %36 : vector<1x1x4x1xf32> to vector<4x1xf32>
    %38 = vector.shape_cast %35 : vector<4x1xf32> to vector<1x1x4x1xf32>
    tpu.vector_store %arg5[%c0_36, %c0_37, %c0_38, %c0_39], %38 {strides = array<i32>} : memref<1x1x4x1xf32, #tpu.memory_space<vmem>>, vector<1x1x4x1xf32>,
    return
  }
  func.func @transform_0(%arg0: i32, %arg1: i32, %arg2: i32) -> (i32, i32, i32) {
    %c1_i32 = arith.constant 1 : i32
    %0 = arith.muli %arg1, %c1_i32 : i32
    %1 = arith.addi %0, %arg2 : i32
    %c0_i32 = arith.constant 0 : i32
    %c0_i32_0 = arith.constant 0 : i32
    return %arg0, %c0_i32, %1 : i32, i32, i32
  }
  func.func @transform_1(%arg0: i32, %arg1: i32, %arg2: i32) -> (i32, i32, i32, i32) {
    %c0_i32 = arith.constant 0 : i32
    %c0_i32_0 = arith.constant 0 : i32
    %c0_i32_1 = arith.constant 0 : i32
    return %arg0, %arg1, %c0_i32, %c0_i32_0 : i32, i32, i32, i32
  }
  func.func @transform_2(%arg0: i32, %arg1: i32, %arg2: i32) -> (i32, i32, i32, i32) {
    %c0_i32 = arith.constant 0 : i32
    %c0_i32_0 = arith.constant 0 : i32
    %c0_i32_1 = arith.constant 0 : i32
    return %arg0, %arg1, %c0_i32, %c0_i32_0 : i32, i32, i32, i32
  }
}

module attributes {stable_mosaic.version = 11 : i64} {
  func.func @_apply_kernel(%arg0: i32, %arg1: i32, %arg2: memref<2x4x16xf32, #tpu.memory_space<vmem>>, %arg3: memref<2x8x16xf32, #tpu.memory_space<vmem>>, %arg4: memref<8x4xf32, #tpu.memory_space<vmem>>, %arg5: memref<8x1xf32, #tpu.memory_space<vmem>>, %arg6: memref<2x8x16xf32, #tpu.memory_space<vmem>>) attributes {dimension_semantics = [#tpu.dimension_semantics<parallel>, #tpu.dimension_semantics<parallel>], iteration_bounds = array<i64: 1, 1>, scalar_prefetch = 0 : i64, scratch_operands = 0 : i64, tpu.core_type = #tpu.core_type<tc>, window_params = [{transform_indices = @transform_0, window_bounds = array<i64: 2, 4, 16>}, {transform_indices = @transform_1, window_bounds = array<i64: 2, 8, 16>}, {pipeline_mode = #tpu.pipeline_mode<synchronous>, transform_indices = @transform_2, window_bounds = array<i64: 8, 4>}, {pipeline_mode = #tpu.pipeline_mode<synchronous>, transform_indices = @transform_3, window_bounds = array<i64: 8, 1>}, {transform_indices = @transform_4, window_bounds = array<i64: 2, 8, 16>}]} {
    %c0 = arith.constant 0 : index
    %c0_0 = arith.constant 0 : index
    %0 = vector.load %arg4[%c0, %c0_0] : memref<8x4xf32, #tpu.memory_space<vmem>>, vector<8x4xf32>
    %c0_1 = arith.constant 0 : index
    %c0_2 = arith.constant 0 : index
    %1 = vector.load %arg5[%c0_1, %c0_2] : memref<8x1xf32, #tpu.memory_space<vmem>>, vector<8x1xf32>
    %c0_3 = arith.constant 0 : index
    %c0_4 = arith.constant 0 : index
    %c0_5 = arith.constant 0 : index
    %2 = vector.load %arg2[%c0_3, %c0_4, %c0_5] : memref<2x4x16xf32, #tpu.memory_space<vmem>>, vector<1x4x16xf32>
    %3 = vector.shape_cast %2 : vector<1x4x16xf32> to vector<4x16xf32>
    %4 = vector.extract_strided_slice %0 {offsets = [0, 0], sizes = [8, 1], strides = [1, 1]} : vector<8x4xf32> to vector<8x1xf32>
    %5 = vector.extract_strided_slice %3 {offsets = [0, 0], sizes = [1, 16], strides = [1, 1]} : vector<4x16xf32> to vector<1x16xf32>
    %6 = vector.broadcast %4 : vector<8x1xf32> to vector<8x16xf32>
    %7 = vector.broadcast %5 : vector<1x16xf32> to vector<8x16xf32>
    %8 = arith.mulf %6, %7 : vector<8x16xf32>
    %9 = vector.extract_strided_slice %0 {offsets = [0, 1], sizes = [8, 1], strides = [1, 1]} : vector<8x4xf32> to vector<8x1xf32>
    %10 = vector.extract_strided_slice %3 {offsets = [1, 0], sizes = [1, 16], strides = [1, 1]} : vector<4x16xf32> to vector<1x16xf32>
    %11 = vector.broadcast %9 : vector<8x1xf32> to vector<8x16xf32>
    %12 = vector.broadcast %10 : vector<1x16xf32> to vector<8x16xf32>
    %13 = arith.mulf %11, %12 : vector<8x16xf32>
    %14 = arith.addf %8, %13 : vector<8x16xf32>
    %15 = vector.extract_strided_slice %0 {offsets = [0, 2], sizes = [8, 1], strides = [1, 1]} : vector<8x4xf32> to vector<8x1xf32>
    %16 = vector.extract_strided_slice %3 {offsets = [2, 0], sizes = [1, 16], strides = [1, 1]} : vector<4x16xf32> to vector<1x16xf32>
    %17 = vector.broadcast %15 : vector<8x1xf32> to vector<8x16xf32>
    %18 = vector.broadcast %16 : vector<1x16xf32> to vector<8x16xf32>
    %19 = arith.mulf %17, %18 : vector<8x16xf32>
    %20 = arith.addf %14, %19 : vector<8x16xf32>
    %21 = vector.extract_strided_slice %0 {offsets = [0, 3], sizes = [8, 1], strides = [1, 1]} : vector<8x4xf32> to vector<8x1xf32>
    %22 = vector.extract_strided_slice %3 {offsets = [3, 0], sizes = [1, 16], strides = [1, 1]} : vector<4x16xf32> to vector<1x16xf32>
    %23 = vector.broadcast %21 : vector<8x1xf32> to vector<8x16xf32>
    %24 = vector.broadcast %22 : vector<1x16xf32> to vector<8x16xf32>
    %25 = arith.mulf %23, %24 : vector<8x16xf32>
    %26 = arith.addf %20, %25 : vector<8x16xf32>
    %27 = vector.broadcast %1 : vector<8x1xf32> to vector<8x16xf32>
    %28 = arith.addf %26, %27 : vector<8x16xf32>
    %c0_6 = arith.constant 0 : index
    %c0_7 = arith.constant 0 : index
    %c0_8 = arith.constant 0 : index
    %29 = vector.load %arg3[%c0_6, %c0_7, %c0_8] : memref<2x8x16xf32, #tpu.memory_space<vmem>>, vector<1x8x16xf32>
    %30 = vector.shape_cast %29 : vector<1x8x16xf32> to vector<8x16xf32>
    %31 = arith.addf %30, %28 : vector<8x16xf32>
    %cst = arith.constant 0.000000e+00 : f32
    %32 = vector.broadcast %cst : f32 to vector<8x16xf32>
    %33 = arith.maximumf %31, %32 : vector<8x16xf32>
    %c0_9 = arith.constant 0 : index
    %c0_10 = arith.constant 0 : index
    %c0_11 = arith.constant 0 : index
    %34 = vector.load %arg6[%c0_9, %c0_10, %c0_11] : memref<2x8x16xf32, #tpu.memory_space<vmem>>, vector<1x8x16xf32>
    %35 = vector.shape_cast %34 : vector<1x8x16xf32> to vector<8x16xf32>
    %36 = vector.shape_cast %33 : vector<8x16xf32> to vector<1x8x16xf32>
    tpu.vector_store %arg6[%c0_9, %c0_10, %c0_11], %36 {strides = array<i32>} : memref<2x8x16xf32, #tpu.memory_space<vmem>>, vector<1x8x16xf32>,
    %c1 = arith.constant 1 : index
    %c0_12 = arith.constant 0 : index
    %c0_13 = arith.constant 0 : index
    %37 = vector.load %arg2[%c1, %c0_12, %c0_13] : memref<2x4x16xf32, #tpu.memory_space<vmem>>, vector<1x4x16xf32>
    %38 = vector.shape_cast %37 : vector<1x4x16xf32> to vector<4x16xf32>
    %39 = vector.extract_strided_slice %0 {offsets = [0, 0], sizes = [8, 1], strides = [1, 1]} : vector<8x4xf32> to vector<8x1xf32>
    %40 = vector.extract_strided_slice %38 {offsets = [0, 0], sizes = [1, 16], strides = [1, 1]} : vector<4x16xf32> to vector<1x16xf32>
    %41 = vector.broadcast %39 : vector<8x1xf32> to vector<8x16xf32>
    %42 = vector.broadcast %40 : vector<1x16xf32> to vector<8x16xf32>
    %43 = arith.mulf %41, %42 : vector<8x16xf32>
    %44 = vector.extract_strided_slice %0 {offsets = [0, 1], sizes = [8, 1], strides = [1, 1]} : vector<8x4xf32> to vector<8x1xf32>
    %45 = vector.extract_strided_slice %38 {offsets = [1, 0], sizes = [1, 16], strides = [1, 1]} : vector<4x16xf32> to vector<1x16xf32>
    %46 = vector.broadcast %44 : vector<8x1xf32> to vector<8x16xf32>
    %47 = vector.broadcast %45 : vector<1x16xf32> to vector<8x16xf32>
    %48 = arith.mulf %46, %47 : vector<8x16xf32>
    %49 = arith.addf %43, %48 : vector<8x16xf32>
    %50 = vector.extract_strided_slice %0 {offsets = [0, 2], sizes = [8, 1], strides = [1, 1]} : vector<8x4xf32> to vector<8x1xf32>
    %51 = vector.extract_strided_slice %38 {offsets = [2, 0], sizes = [1, 16], strides = [1, 1]} : vector<4x16xf32> to vector<1x16xf32>
    %52 = vector.broadcast %50 : vector<8x1xf32> to vector<8x16xf32>
    %53 = vector.broadcast %51 : vector<1x16xf32> to vector<8x16xf32>
    %54 = arith.mulf %52, %53 : vector<8x16xf32>
    %55 = arith.addf %49, %54 : vector<8x16xf32>
    %56 = vector.extract_strided_slice %0 {offsets = [0, 3], sizes = [8, 1], strides = [1, 1]} : vector<8x4xf32> to vector<8x1xf32>
    %57 = vector.extract_strided_slice %38 {offsets = [3, 0], sizes = [1, 16], strides = [1, 1]} : vector<4x16xf32> to vector<1x16xf32>
    %58 = vector.broadcast %56 : vector<8x1xf32> to vector<8x16xf32>
    %59 = vector.broadcast %57 : vector<1x16xf32> to vector<8x16xf32>
    %60 = arith.mulf %58, %59 : vector<8x16xf32>
    %61 = arith.addf %55, %60 : vector<8x16xf32>
    %62 = vector.broadcast %1 : vector<8x1xf32> to vector<8x16xf32>
    %63 = arith.addf %61, %62 : vector<8x16xf32>
    %c1_14 = arith.constant 1 : index
    %c0_15 = arith.constant 0 : index
    %c0_16 = arith.constant 0 : index
    %64 = vector.load %arg3[%c1_14, %c0_15, %c0_16] : memref<2x8x16xf32, #tpu.memory_space<vmem>>, vector<1x8x16xf32>
    %65 = vector.shape_cast %64 : vector<1x8x16xf32> to vector<8x16xf32>
    %66 = arith.addf %65, %63 : vector<8x16xf32>
    %cst_17 = arith.constant 0.000000e+00 : f32
    %67 = vector.broadcast %cst_17 : f32 to vector<8x16xf32>
    %68 = arith.maximumf %66, %67 : vector<8x16xf32>
    %c1_18 = arith.constant 1 : index
    %c0_19 = arith.constant 0 : index
    %c0_20 = arith.constant 0 : index
    %69 = vector.load %arg6[%c1_18, %c0_19, %c0_20] : memref<2x8x16xf32, #tpu.memory_space<vmem>>, vector<1x8x16xf32>
    %70 = vector.shape_cast %69 : vector<1x8x16xf32> to vector<8x16xf32>
    %71 = vector.shape_cast %68 : vector<8x16xf32> to vector<1x8x16xf32>
    tpu.vector_store %arg6[%c1_18, %c0_19, %c0_20], %71 {strides = array<i32>} : memref<2x8x16xf32, #tpu.memory_space<vmem>>, vector<1x8x16xf32>,
    return
  }
  func.func @transform_0(%arg0: i32, %arg1: i32) -> (i32, i32, i32) {
    %c0_i32 = arith.constant 0 : i32
    %c0_i32_0 = arith.constant 0 : i32
    return %arg0, %c0_i32, %arg1 : i32, i32, i32
  }
  func.func @transform_1(%arg0: i32, %arg1: i32) -> (i32, i32, i32) {
    %c0_i32 = arith.constant 0 : i32
    %c0_i32_0 = arith.constant 0 : i32
    return %arg0, %c0_i32, %arg1 : i32, i32, i32
  }
  func.func @transform_2(%arg0: i32, %arg1: i32) -> (i32, i32) {
    %c0_i32 = arith.constant 0 : i32
    %c0_i32_0 = arith.constant 0 : i32
    %c0_i32_1 = arith.constant 0 : i32
    return %c0_i32, %c0_i32_0 : i32, i32
  }
  func.func @transform_3(%arg0: i32, %arg1: i32) -> (i32, i32) {
    %c0_i32 = arith.constant 0 : i32
    %c0_i32_0 = arith.constant 0 : i32
    %c0_i32_1 = arith.constant 0 : i32
    return %c0_i32, %c0_i32_0 : i32, i32
  }
  func.func @transform_4(%arg0: i32, %arg1: i32) -> (i32, i32, i32) {
    %c0_i32 = arith.constant 0 : i32
    %c0_i32_0 = arith.constant 0 : i32
    return %arg0, %c0_i32, %arg1 : i32, i32, i32
  }
}

</mosaic_0001>

<bundles_post_ra>
// kernel: residual_forward.2
= control target key start
LH: loop header
LB: loop body
LE: loop exit
PB: predicated region body
PF: predicated region fallthrough
CT: control target
= control target key end

     0   :  { %vm37_vm0 = vcmask 130048   ;;  %vm115_vm1 = vcmask 125952   ;;  %v241_v0 = vmov 0.0   ;;  %vm242_vm2 = vmmov 0   ;;  %s306_s0 = inlined_call_operand.vmem [shape: f32[2,4,16], index: 0, kind: input, shape index: {}]   ;;  %s307_s2 = inlined_call_operand.vmem [shape: f32[1,1,4,1], index: 2, kind: output, shape index: {1}]   ;;  %s308_s1 = inlined_call_operand.vmem [shape: f32[1,1,4,4], index: 1, kind: output, shape index: {0}]  }
   0x1   :  { %229 = vmatprep.subr.mxu0 %v241_v0  ;;  %v35_v1 = vld [vmem:[%s306_s0] sm:$0xf]  ;;  %231 = vmatprep.mubr.msk.f32.mxu0 %vm242_vm2, %v241_v0  ;;  %v222_v2 = vld [vmem:[%s306_s0 + $0x4] sm:$0xf]  ;;  %vm33_vm3 = vcmask 3072   ;;  %vm31_vm4 = vcmask 27648  }
   0x2   :  { %230 = vmatpush3.xpose.msk.msra.mxu0 %vm37_vm0, %v35_v1  ;;  %234 = vmatprep.subr.mxu1 %v241_v0  ;;  %v116_v3 = vsel %vm115_vm1, %v35_v1, 0.0  ;;  %34 = vst.msk [vmem:[%s307_s2] sm:$0xf] %vm33_vm3, %v241_v0  ;;  %v201_v4 = vsel %vm115_vm1, %v222_v2, 0.0 }
   0x3   :  { %235 = vmatpush3.xpose.msk.msra.mxu1 %vm37_vm0, %v222_v2  ;;  %236 = vmatprep.mubr.msk.f32.mxu1 %vm242_vm2, %v241_v0  ;;  %32 = vst.msk [vmem:[%s308_s1] sm:$0xf] %vm31_vm4, %v241_v0 }
   0x4   :  { %117 = vadd.xlane.f32.xlu0 %v116_v3 }
   0x5   :  { %232 = vmatmul.mubr.msk.f32.vlgmr.msra.gmra.mxu0 %vm37_vm0, %v35_v1 }
   0x6   :  { %237 = vmatmul.mubr.msk.f32.vlgmr.msra.gmra.mxu1 %vm37_vm0, %v222_v2 }
   0x8   :  { %202 = vadd.xlane.f32.xlu0 %v201_v4 }
   0x9   :  { %v114_v5 = vld [vmem:[%s307_s2] sm:$0xf] }
   0xa   :  { %v36_v11 = vld [vmem:[%s308_s1] sm:$0xf] }
  0x8d   :  { %v118_v6 = vpop.xlane.xlu0 %117 }
  0x8e   :  { %v119_v7 = vadd.f32 %v118_v6, %v114_v5 }
  0x90   :  { %121 = vst.msk [vmem:[%s307_s2] sm:$0xf] %vm33_vm3, %v119_v7 }
  0x91   :  { %v203_v8 = vpop.xlane.xlu0 %202 }
  0x97   :  { %v200_v9 = vld [vmem:[%s307_s2] sm:$0xf] }
  0x98   :  { %v204_v10 = vadd.f32 %v203_v8, %v200_v9 }
  0x9a   :  { %205 = vst.msk [vmem:[%s307_s2] sm:$0xf] %vm33_vm3, %v204_v10 }
  0xc5   :  { %v107_v12 = vpop.f32.mrf.mxu0 }
  0xc6   :  { %v111_v13 = vadd.f32 %v107_v12, %v36_v11  ;;  %v194_v14 = vpop.f32.mrf.mxu1 }
  0xc7   :  { %v233_v15 = vpop.f32.mrf.mxu0 }
  0xc8   :  { %113 = vst.msk [vmem:[%s308_s1] sm:$0xf] %vm31_vm4, %v111_v13  ;;  %v238_v16 = vpop.f32.mrf.mxu1 }
  0xcf   :  { %v124_v17 = vld [vmem:[%s308_s1] sm:$0xf] }
  0xd0   :  { %v198_v18 = vadd.f32 %v194_v14, %v124_v17 }
  0xd2   :  { %199 = vst.msk [vmem:[%s308_s1] sm:$0xf] %vm31_vm4, %v198_v18 }

// kernel: residual_forward.3
= control target key start
LH: loop header
LB: loop body
LE: loop exit
PB: predicated region body
PF: predicated region fallthrough
CT: control target
= control target key end

     0   :  { %9 = vsyncpa [#allocation3], 0  ;;  %s251_s0 = inlined_call_operand.vmem [shape: f32[2,4,16], index: 0, kind: input, shape index: {}]   ;;  %s252_s1 = inlined_call_operand.hbm [shape: f32[2,8,16], index: 1, kind: input, shape index: {}, may-alias: {1,4}]   ;;  %s253_s2 = inlined_call_operand.vmem [shape: f32[8,4], index: 2, kind: input, shape index: {}]   ;;  %s254_s3 = inlined_call_operand.vmem [shape: f32[8,1], index: 3, kind: input, shape index: {}]   ;;  %s255_s4 = inlined_call_operand.hbm [shape: f32[2,8,16], index: 4, kind: output, shape index: {}, may-alias: {1,4}]  }
   0x1   :  { %10 = vsyncpa [#allocation4], 0  ;;  %s194_s15 = smov [#allocation2]  }
   0x2   :  { %s18_s16 = sshll.u32 %s194_s15, 4  ;;  %s19_s16 = int_to_ptr.vmem [resolvable:$true] %s18_s16 }
   0x3   :  { %s158_s17 = scalar_lea.vmem %s19_s16, 256  ;;  %p163_p1 = scmp.lt.s32.totalorder %s19_s16, %s19_s16 }
   0x4   :  { %p159_p0 = scmp.ne.s32.totalorder %s19_s16, %s158_s17  ;;  %p164_p2 = scmp.lt.s32.totalorder %s158_s17, %s158_s17 }
   0x6   :  { %p165_p3 = por %p164_p2, %p163_p1 }
   0x8   :  { %p166_p4 = pnand %p165_p3, %p159_p0 }
   0xa   :  { %169 = shalt.err (!%p166_p4)
}
   0xb   :  { %s195_s18 = smov 128   ;;  %s196_s19 = smov 8  }
   0xc   :  { %24 = dma.hbm_to_vmem [thread:$0]  %s252_s1, 256, %s19_s16, [#allocation3], %s195_s18, %s195_s18, %s196_s19  }
   0xd   :  { %190 = dma.done.wait [#allocation3], 256  }
   0xe   :  { %191 = vsyncadd [#allocation3], 4294967040  ;;  %v197_v0 = vmov 0   ;;  %v198_v1 = vmov 2   ;;  %v32_v2 = vld [vmem:[%s253_s2] sm:$0xff]  ;;  %v199_v3 = vmov 1   ;;  %v40_v6 = vlaneseq }
   0xf   :  { %144 = vset.pattern.permute.xlu0 %v197_v0  ;;  %146 = vset.pattern.permute.xlu1 %v198_v1  ;;  %v200_v4 = vmov 3   ;;  %v33_v5 = vld [vmem:[%s254_s3] sm:$0xff]  ;;  %v113_v42 = vld [vmem:[#allocation2 + $0x8] sm:$0xff]  ;;  %vm84_vm0 = vcmask 130048  }
  0x10   :  { %37 = vperm.xlu0 %144, %v32_v2   ;;  %56 = vperm.xlu1 %146, %v32_v2   ;;  %v41_v7 = vshrl.u32 %v40_v6, 7  ;;  %v34_v10 = vld [vmem:[%s251_s0] sm:$0xf]  ;;  %v135_v11 = vld [vmem:[%s251_s0 + $0x4] sm:$0xf]  ;;  %s201_s0 = smov [#allocation5]  }
  0x11   :  { %v81_v41 = vld [vmem:[#allocation2] sm:$0xff]  ;;  %s123_s3 = sshll.u32 %s201_s0, 4  ;;  %s124_s3 = int_to_ptr.vmem [resolvable:$true] %s123_s3 }
  0x12   :  { %v42_v8 = vsub.s32 0, %v41_v7  ;;  %v51_v9 = vsub.s32 1, %v41_v7  ;;  %v61_v12 = vsub.s32 2, %v41_v7  ;;  %v71_v15 = vsub.s32 3, %v41_v7  ;;  %s170_s28 = scalar_lea.vmem %s124_s3, 256  ;;  %p175_p6 = scmp.lt.s32.totalorder %s124_s3, %s124_s3 }
  0x13   :  { %p171_p5 = scmp.ne.s32.totalorder %s124_s3, %s170_s28  ;;  %p176_p7 = scmp.lt.s32.totalorder %s170_s28, %s170_s28 }
  0x14   :  { %145 = vset.pattern.permute.xlu0 %v199_v3  ;;  %147 = vset.pattern.permute.xlu1 %v200_v4  ;;  %v43_v16 = vrot.slane %v34_v10, %v42_v8  ;;  %v91_v17 = vrot.slane %v135_v11, %v42_v8  ;;  %v52_v18 = vrot.slane %v34_v10, %v51_v9 }
  0x15   :  { %46 = vperm.xlu0 %145, %v32_v2   ;;  %66 = vperm.xlu1 %147, %v32_v2   ;;  %v96_v19 = vrot.slane %v135_v11, %v51_v9  ;;  %v62_v20 = vrot.slane %v34_v10, %v61_v12  ;;  %v102_v21 = vrot.slane %v135_v11, %v61_v12  ;;  %p177_p8 = por %p176_p7, %p175_p6 }
  0x16   :  { %v72_v22 = vrot.slane %v34_v10, %v71_v15  ;;  %v108_v23 = vrot.slane %v135_v11, %v71_v15 }
  0x17   :  { %p178_p9 = pnand %p177_p8, %p171_p5 }
  0x19   :  { %148 = vset.pattern.permute.xlu1 %v197_v0  ;;  %149 = vset.pattern.permute.xlu0 %v197_v0 }
  0x1a   :  { %77 = vperm.xlu1 %148, %v33_v5  }
  0x8b   :  { %v38_v13 = vpop.permute.xlu0 %37  ;;  %v57_v14 = vpop.permute.xlu1 %56 }
  0x8c   :  { %v44_v26 = vmul.f32 %v43_v16, %v38_v13  ;;  %v92_v27 = vmul.f32 %v91_v17, %v38_v13  ;;  %v63_v30 = vmul.f32 %v62_v20, %v57_v14  ;;  %v103_v31 = vmul.f32 %v102_v21, %v57_v14 }
  0x90   :  { %v47_v24 = vpop.permute.xlu0 %46  ;;  %v67_v25 = vpop.permute.xlu1 %66 }
  0x91   :  { %v53_v28 = vmul.f32 %v52_v18, %v47_v24  ;;  %v97_v29 = vmul.f32 %v96_v19, %v47_v24  ;;  %v73_v34 = vmul.f32 %v72_v22, %v67_v25  ;;  %v109_v35 = vmul.f32 %v108_v23, %v67_v25 }
  0x93   :  { %v54_v32 = vadd.f32 %v53_v28, %v44_v26  ;;  %v98_v33 = vadd.f32 %v97_v29, %v92_v27 }
  0x95   :  { %v64_v36 = vadd.f32 %v63_v30, %v54_v32  ;;  %v104_v37 = vadd.f32 %v103_v31, %v98_v33  ;;  %v78_v38 = vpop.permute.xlu1 %77 }
  0x97   :  { %v74_v39 = vadd.f32 %v73_v34, %v64_v36  ;;  %v110_v40 = vadd.f32 %v109_v35, %v104_v37 }
  0x99   :  { %v80_v43 = vadd.f32 %v78_v38, %v74_v39  ;;  %v111_v44 = vadd.f32 %v110_v40, %v78_v38 }
  0x9b   :  { %v82_v45 = vadd.f32 %v81_v41, %v80_v43  ;;  %v114_v46 = vadd.f32 %v113_v42, %v111_v44 }
  0x9d   :  { %v83_v47 = vmax.f32 %v82_v45, 0.0  ;;  %v115_v48 = vmax.f32 %v114_v46, 0.0 }
  0x9f   :  { %85 = vst.msk [vmem:[#allocation5] sm:$0xff] %vm84_vm0, %v83_v47  ;;  %117 = vst.msk [vmem:[#allocation5 + $0x8] sm:$0xff] %vm84_vm0, %v115_v48 }
  0xa0   :  { %181 = shalt.err (!%p178_p9)
}
  0xa1   :  { %129 = dma.vmem_to_hbm [thread:$0]  %s124_s3, 256, %s255_s4, [#allocation4], %s195_s18, %s195_s18, %s196_s19  }
  0xa2   :  { %192 = dma.done.wait [#allocation4], 256  }
  0xa3   :  { %193 = vsyncadd [#allocation4], 4294967040 }
  0xa4   :  { %133 = vsyncpa [#allocation3], 1 }
  0xa5   :  { %134 = vsyncpa [#allocation4], 1 }

</bundles_post_ra>
